<compile_context>
chip_gen: v7x
topology: tpu7x:2x2x1
jax: 0.10.0
libtpu: 0.0.40
codegen_flags: <defaults>
</compile_context>

<pallas_src>
import functools

import jax
import jax.numpy as jnp
from jax.experimental import pallas as pl
from jax.experimental.pallas import tpu as pltpu


def _sigmoid_f32(h):
    # 1 / (1 + exp(-h)): exp on the EUP, approx reciprocal also on the EUP
    # (avoids the full-precision VPU divide chain).  f32 math everywhere so it
    # is also safe on v5e (no bf16 VPU/EUP there).
    return pl.reciprocal(1.0 + jnp.exp(-h), approx=True)


def _mlp_kernel(x_ref, w1_ref, b1_ref, w2_ref, b2_ref, w3_ref, b3_ref,
                w4_ref, b4_ref, out_ref):
    """Fused 4-layer MLP (Linear-Sigmoid-Linear-ReLU-Linear-Sigmoid-Linear).

    x_ref  : (in_pad, TILE_B)   bf16  -- batch on the lane axis (lane-dense)
    wN_ref : (out_N, in_N)      bf16  -- PyTorch (out, in) layout, h = W @ x
    bN_ref : (out_N, 1)         f32   -- broadcasts across lanes (batch)
    out_ref: (dim_out, TILE_B)  bf16
    """
    x = x_ref[...]

    # Layer 1: Linear + Sigmoid  (bf16 MXU operands, f32 accumulate / act)
    h = jnp.dot(w1_ref[...], x, preferred_element_type=jnp.float32) + b1_ref[...]
    h = _sigmoid_f32(h)

    # Layer 2: Linear + ReLU
    h = jnp.dot(w2_ref[...], h.astype(jnp.bfloat16),
                preferred_element_type=jnp.float32) + b2_ref[...]
    h = jnp.maximum(h, 0.0)

    # Layer 3: Linear + Sigmoid
    h = jnp.dot(w3_ref[...], h.astype(jnp.bfloat16),
                preferred_element_type=jnp.float32) + b3_ref[...]
    h = _sigmoid_f32(h)

    # Layer 4: Linear (output head) -> lane-dense (dim_out, TILE_B) store
    y = jnp.dot(w4_ref[...], h.astype(jnp.bfloat16),
                preferred_element_type=jnp.float32) + b4_ref[...]
    out_ref[...] = y.astype(out_ref.dtype)


def _choose_tiling(batch, tile_b):
    """Pick (tile_b, n_tiles): 128-multiple lane tiles; even #tiles when >1
    so the 'parallel' grid axis shards evenly across v7x's two TensorCores."""
    tile_b = max(128, (tile_b // 128) * 128)
    n_tiles = max(1, -(-batch // tile_b))
    if n_tiles > 1 and n_tiles % 2:
        n_tiles += 1
    tile = -(-batch // n_tiles)
    tile = -(-tile // 128) * 128
    return tile, n_tiles


@functools.partial(jax.jit, static_argnames=("tile_b", "out_dtype"))
def net_nomatrix16_forward(x, params, *, tile_b=16384, out_dtype=jnp.bfloat16):
    """Run the fused MLP Pallas kernel.

    x: (batch, 2*dim - 1) float32
    params: dict with w1..w4 in (out, in) layout and b1..b4 as (out, 1)
    returns: (batch, dim) in out_dtype (default bf16 to halve the output stream)
    """
    batch, in_dim = x.shape
    hidden = params["w1"].shape[0]
    dim_out = params["w4"].shape[0]

    tile_b, n_tiles = _choose_tiling(batch, tile_b)
    padded = n_tiles * tile_b

    # Pad the layer-1 K dimension (e.g. 15 -> 16) so bf16 sublanes pack fully;
    # zero rows in x / zero columns in w1 keep the math exact.
    in_pad = max(in_dim, (-(-in_dim // 16)) * 16)

    # Batch on lane axis, bf16 input stream.  Under jit the pad / transpose /
    # cast fuse instead of being separate HBM round-trips.
    x_t = jnp.pad(x, ((0, padded - batch), (0, in_pad - in_dim))
                  ).T.astype(jnp.bfloat16)

    w1 = jnp.pad(params["w1"], ((0, 0), (0, in_pad - in_dim))).astype(jnp.bfloat16)
    w2 = params["w2"].astype(jnp.bfloat16)
    w3 = params["w3"].astype(jnp.bfloat16)
    w4 = params["w4"].astype(jnp.bfloat16)
    b1, b2, b3, b4 = params["b1"], params["b2"], params["b3"], params["b4"]

    # Weights / biases: full block, constant index_map -> stay VMEM-resident
    # across the whole grid; only the x / out tiles stream (double-buffered).
    const_spec = lambda a: pl.BlockSpec(a.shape, lambda i: (0,) * a.ndim)

    flops = 2 * padded * (in_pad * hidden + 2 * hidden * hidden + hidden * dim_out)
    transcendentals = 2 * padded * hidden  # two sigmoid layers (exp per element)
    bytes_accessed = (
        padded * in_pad * 2                              # x (bf16)
        + padded * dim_out * jnp.dtype(out_dtype).itemsize
        + sum(int(w.size) * 2 for w in (w1, w2, w3, w4))
        + sum(int(b.size) * 4 for b in (b1, b2, b3, b4)))

    out_t = pl.pallas_call(
        _mlp_kernel,
        out_shape=jax.ShapeDtypeStruct((dim_out, padded), out_dtype),
        grid=(n_tiles,),
        in_specs=[
            pl.BlockSpec((in_pad, tile_b), lambda i: (0, i)),
            const_spec(w1), const_spec(b1),
            const_spec(w2), const_spec(b2),
            const_spec(w3), const_spec(b3),
            const_spec(w4), const_spec(b4),
        ],
        out_specs=pl.BlockSpec((dim_out, tile_b), lambda i: (0, i)),
        compiler_params=pltpu.CompilerParams(
            dimension_semantics=("parallel",),     # megacore sharding on v7x
            vmem_limit_bytes=32 * 1024 * 1024),    # big tiles also fit v5e's limit
        cost_estimate=pl.CostEstimate(
            flops=flops,
            transcendentals=transcendentals,
            bytes_accessed=bytes_accessed),
    )(x_t, w1, b1, w2, b2, w3, b3, w4, b4)

    return out_t.T[:batch]


def init_params(dim, n_hidden_nodes=None, seed=0):
    """Deterministic init mimicking nn.Linear defaults: U(-k, k), k=1/sqrt(fan_in).

    Weights are stored in the PyTorch (out, in) layout; biases as (out, 1).
    """
    hidden = 16 if n_hidden_nodes is None else n_hidden_nodes
    in_dim = 2 * dim - 1
    dims = [(hidden, in_dim), (hidden, hidden), (hidden, hidden), (dim, hidden)]
    key = jax.random.PRNGKey(seed)
    params = {}
    for i, (fan_out, fan_in) in enumerate(dims, start=1):
        key, kw, kb = jax.random.split(key, 3)
        k = 1.0 / jnp.sqrt(jnp.float32(fan_in))
        params[f"w{i}"] = jax.random.uniform(
            kw, (fan_out, fan_in), jnp.float32, minval=-k, maxval=k)
        params[f"b{i}"] = jax.random.uniform(
            kb, (fan_out, 1), jnp.float32, minval=-k, maxval=k)
    return params


def reference_forward(x, params):
    """Pure-JAX f32 reference of NetNomatrix16.forward."""
    h = jax.nn.sigmoid(x @ params["w1"].T + params["b1"][:, 0])
    h = jnp.maximum(h @ params["w2"].T + params["b2"][:, 0], 0.0)
    h = jax.nn.sigmoid(h @ params["w3"].T + params["b3"][:, 0])
    return h @ params["w4"].T + params["b4"][:, 0]


if __name__ == "__main__":
    dim = 8        # NetNomatrix16(dim=8) -> input features = 2*8-1 = 15
    batch = 200    # deliberately NOT a multiple of 128 to exercise tail padding
    params = init_params(dim)

    key = jax.random.PRNGKey(0)
    x = jax.random.normal(key, (batch, 2 * dim - 1), dtype=jnp.float32)

    out = net_nomatrix16_forward(x, params)        # default big-tile config
    out = jax.block_until_ready(out)

    ref = reference_forward(x, params)
    assert out.shape == (batch, dim)
    # bf16 MXU operands / bf16 output (with f32 accumulation) -> loose tolerance.
    err = float(jnp.max(jnp.abs(out.astype(jnp.float32) - ref)))
    assert jnp.allclose(out.astype(jnp.float32), ref, atol=5e-2, rtol=5e-2), err

    # Also exercise the multi-tile (even grid) path.
    out2 = jax.block_until_ready(net_nomatrix16_forward(x, params, tile_b=128))
    assert jnp.allclose(out2.astype(jnp.float32), ref, atol=5e-2, rtol=5e-2)

    print("KERNEL_OK")
</pallas_src>

<mosaic_0001>
module attributes {stable_mosaic.version = 11 : i64} {
  func.func @_mlp_kernel(%arg0: i32, %arg1: memref<16x256xbf16, #tpu.memory_space<vmem>>, %arg2: memref<16x16xbf16, #tpu.memory_space<vmem>>, %arg3: memref<16x1xf32, #tpu.memory_space<vmem>>, %arg4: memref<16x16xbf16, #tpu.memory_space<vmem>>, %arg5: memref<16x1xf32, #tpu.memory_space<vmem>>, %arg6: memref<16x16xbf16, #tpu.memory_space<vmem>>, %arg7: memref<16x1xf32, #tpu.memory_space<vmem>>, %arg8: memref<8x16xbf16, #tpu.memory_space<vmem>>, %arg9: memref<8x1xf32, #tpu.memory_space<vmem>>, %arg10: memref<8x256xbf16, #tpu.memory_space<vmem>>) attributes {dimension_semantics = [#tpu.dimension_semantics<parallel>], iteration_bounds = array<i64: 1>, scalar_prefetch = 0 : i64, scratch_operands = 0 : i64, tpu.core_type = #tpu.core_type<tc>, window_params = [{transform_indices = @transform_0, window_bounds = array<i64: 16, 256>}, {pipeline_mode = #tpu.pipeline_mode<synchronous>, transform_indices = @transform_1, window_bounds = array<i64: 16, 16>}, {pipeline_mode = #tpu.pipeline_mode<synchronous>, transform_indices = @transform_2, window_bounds = array<i64: 16, 1>}, {pipeline_mode = #tpu.pipeline_mode<synchronous>, transform_indices = @transform_3, window_bounds = array<i64: 16, 16>}, {pipeline_mode = #tpu.pipeline_mode<synchronous>, transform_indices = @transform_4, window_bounds = array<i64: 16, 1>}, {pipeline_mode = #tpu.pipeline_mode<synchronous>, transform_indices = @transform_5, window_bounds = array<i64: 16, 16>}, {pipeline_mode = #tpu.pipeline_mode<synchronous>, transform_indices = @transform_6, window_bounds = array<i64: 16, 1>}, {pipeline_mode = #tpu.pipeline_mode<synchronous>, transform_indices = @transform_7, window_bounds = array<i64: 8, 16>}, {pipeline_mode = #tpu.pipeline_mode<synchronous>, transform_indices = @transform_8, window_bounds = array<i64: 8, 1>}, {transform_indices = @transform_9, window_bounds = array<i64: 8, 256>}]} {
    %c0 = arith.constant 0 : index
    %c0_0 = arith.constant 0 : index
    %0 = vector.load %arg1[%c0, %c0_0] : memref<16x256xbf16, #tpu.memory_space<vmem>>, vector<16x256xbf16>
    %c0_1 = arith.constant 0 : index
    %c0_2 = arith.constant 0 : index
    %1 = vector.load %arg2[%c0_1, %c0_2] : memref<16x16xbf16, #tpu.memory_space<vmem>>, vector<16x16xbf16>
    %cst = arith.constant dense<0.000000e+00> : vector<16x256xf32>
    %2 = tpu.matmul %1, %0, %cst {dimension_numbers = #tpu.dot_dimension_numbers<[1], [0], [0], [1], [0, 0, 1, 1], [], []>} : vector<16x16xbf16>, vector<16x256xbf16>, vector<16x256xf32> -> vector<16x256xf32>
    %c0_3 = arith.constant 0 : index
    %c0_4 = arith.constant 0 : index
    %3 = vector.load %arg3[%c0_3, %c0_4] : memref<16x1xf32, #tpu.memory_space<vmem>>, vector<16x1xf32>
    %4 = vector.broadcast %3 : vector<16x1xf32> to vector<16x256xf32>
    %5 = arith.addf %2, %4 : vector<16x256xf32>
    %cst_5 = arith.constant 0.000000e+00 : f32
    %6 = vector.broadcast %cst_5 : f32 to vector<16x256xf32>
    %7 = arith.subf %6, %5 : vector<16x256xf32>
    %8 = math.exp %7 : vector<16x256xf32>
    %cst_6 = arith.constant 1.000000e+00 : f32
    %9 = vector.broadcast %cst_6 : f32 to vector<16x256xf32>
    %10 = arith.addf %9, %8 : vector<16x256xf32>
    %11 = tpu.reciprocal %10 {approx = true} : vector<16x256xf32> -> vector<16x256xf32>
    %c0_7 = arith.constant 0 : index
    %c0_8 = arith.constant 0 : index
    %12 = vector.load %arg4[%c0_7, %c0_8] : memref<16x16xbf16, #tpu.memory_space<vmem>>, vector<16x16xbf16>
    %13 = arith.truncf %11 : vector<16x256xf32> to vector<16x256xbf16>
    %cst_9 = arith.constant dense<0.000000e+00> : vector<16x256xf32>
    %14 = tpu.matmul %12, %13, %cst_9 {dimension_numbers = #tpu.dot_dimension_numbers<[1], [0], [0], [1], [0, 0, 1, 1], [], []>} : vector<16x16xbf16>, vector<16x256xbf16>, vector<16x256xf32> -> vector<16x256xf32>
    %c0_10 = arith.constant 0 : index
    %c0_11 = arith.constant 0 : index
    %15 = vector.load %arg5[%c0_10, %c0_11] : memref<16x1xf32, #tpu.memory_space<vmem>>, vector<16x1xf32>
    %16 = vector.broadcast %15 : vector<16x1xf32> to vector<16x256xf32>
    %17 = arith.addf %14, %16 : vector<16x256xf32>
    %cst_12 = arith.constant 0.000000e+00 : f32
    %18 = vector.broadcast %cst_12 : f32 to vector<16x256xf32>
    %19 = arith.maximumf %17, %18 : vector<16x256xf32>
    %c0_13 = arith.constant 0 : index
    %c0_14 = arith.constant 0 : index
    %20 = vector.load %arg6[%c0_13, %c0_14] : memref<16x16xbf16, #tpu.memory_space<vmem>>, vector<16x16xbf16>
    %21 = arith.truncf %19 : vector<16x256xf32> to vector<16x256xbf16>
    %cst_15 = arith.constant dense<0.000000e+00> : vector<16x256xf32>
    %22 = tpu.matmul %20, %21, %cst_15 {dimension_numbers = #tpu.dot_dimension_numbers<[1], [0], [0], [1], [0, 0, 1, 1], [], []>} : vector<16x16xbf16>, vector<16x256xbf16>, vector<16x256xf32> -> vector<16x256xf32>
    %c0_16 = arith.constant 0 : index
    %c0_17 = arith.constant 0 : index
    %23 = vector.load %arg7[%c0_16, %c0_17] : memref<16x1xf32, #tpu.memory_space<vmem>>, vector<16x1xf32>
    %24 = vector.broadcast %23 : vector<16x1xf32> to vector<16x256xf32>
    %25 = arith.addf %22, %24 : vector<16x256xf32>
    %cst_18 = arith.constant 0.000000e+00 : f32
    %26 = vector.broadcast %cst_18 : f32 to vector<16x256xf32>
    %27 = arith.subf %26, %25 : vector<16x256xf32>
    %28 = math.exp %27 : vector<16x256xf32>
    %cst_19 = arith.constant 1.000000e+00 : f32
    %29 = vector.broadcast %cst_19 : f32 to vector<16x256xf32>
    %30 = arith.addf %29, %28 : vector<16x256xf32>
    %31 = tpu.reciprocal %30 {approx = true} : vector<16x256xf32> -> vector<16x256xf32>
    %c0_20 = arith.constant 0 : index
    %c0_21 = arith.constant 0 : index
    %32 = vector.load %arg8[%c0_20, %c0_21] : memref<8x16xbf16, #tpu.memory_space<vmem>>, vector<8x16xbf16>
    %33 = arith.truncf %31 : vector<16x256xf32> to vector<16x256xbf16>
    %cst_22 = arith.constant dense<0.000000e+00> : vector<8x256xf32>
    %34 = tpu.matmul %32, %33, %cst_22 {dimension_numbers = #tpu.dot_dimension_numbers<[1], [0], [0], [1], [0, 0, 1, 1], [], []>} : vector<8x16xbf16>, vector<16x256xbf16>, vector<8x256xf32> -> vector<8x256xf32>
    %c0_23 = arith.constant 0 : index
    %c0_24 = arith.constant 0 : index
    %35 = vector.load %arg9[%c0_23, %c0_24] : memref<8x1xf32, #tpu.memory_space<vmem>>, vector<8x1xf32>
    %36 = vector.broadcast %35 : vector<8x1xf32> to vector<8x256xf32>
    %37 = arith.addf %34, %36 : vector<8x256xf32>
    %38 = arith.truncf %37 : vector<8x256xf32> to vector<8x256xbf16>
    %c0_25 = arith.constant 0 : index
    %c0_26 = arith.constant 0 : index
    %39 = vector.load %arg10[%c0_25, %c0_26] : memref<8x256xbf16, #tpu.memory_space<vmem>>, vector<8x256xbf16>
    tpu.vector_store %arg10[%c0_25, %c0_26], %38 {strides = array<i32>} : memref<8x256xbf16, #tpu.memory_space<vmem>>, vector<8x256xbf16>,
    return
  }
  func.func @transform_0(%arg0: i32) -> (i32, i32) {
    %c0_i32 = arith.constant 0 : i32
    %c0_i32_0 = arith.constant 0 : i32
    return %c0_i32, %arg0 : i32, i32
  }
  func.func @transform_1(%arg0: i32) -> (i32, i32) {
    %c0_i32 = arith.constant 0 : i32
    %c0_i32_0 = arith.constant 0 : i32
    %c0_i32_1 = arith.constant 0 : i32
    return %c0_i32, %c0_i32_0 : i32, i32
  }
  func.func @transform_2(%arg0: i32) -> (i32, i32) {
    %c0_i32 = arith.constant 0 : i32
    %c0_i32_0 = arith.constant 0 : i32
    %c0_i32_1 = arith.constant 0 : i32
    return %c0_i32, %c0_i32_0 : i32, i32
  }
  func.func @transform_3(%arg0: i32) -> (i32, i32) {
    %c0_i32 = arith.constant 0 : i32
    %c0_i32_0 = arith.constant 0 : i32
    %c0_i32_1 = arith.constant 0 : i32
    return %c0_i32, %c0_i32_0 : i32, i32
  }
  func.func @transform_4(%arg0: i32) -> (i32, i32) {
    %c0_i32 = arith.constant 0 : i32
    %c0_i32_0 = arith.constant 0 : i32
    %c0_i32_1 = arith.constant 0 : i32
    return %c0_i32, %c0_i32_0 : i32, i32
  }
  func.func @transform_5(%arg0: i32) -> (i32, i32) {
    %c0_i32 = arith.constant 0 : i32
    %c0_i32_0 = arith.constant 0 : i32
    %c0_i32_1 = arith.constant 0 : i32
    return %c0_i32, %c0_i32_0 : i32, i32
  }
  func.func @transform_6(%arg0: i32) -> (i32, i32) {
    %c0_i32 = arith.constant 0 : i32
    %c0_i32_0 = arith.constant 0 : i32
    %c0_i32_1 = arith.constant 0 : i32
    return %c0_i32, %c0_i32_0 : i32, i32
  }
  func.func @transform_7(%arg0: i32) -> (i32, i32) {
    %c0_i32 = arith.constant 0 : i32
    %c0_i32_0 = arith.constant 0 : i32
    %c0_i32_1 = arith.constant 0 : i32
    return %c0_i32, %c0_i32_0 : i32, i32
  }
  func.func @transform_8(%arg0: i32) -> (i32, i32) {
    %c0_i32 = arith.constant 0 : i32
    %c0_i32_0 = arith.constant 0 : i32
    %c0_i32_1 = arith.constant 0 : i32
    return %c0_i32, %c0_i32_0 : i32, i32
  }
  func.func @transform_9(%arg0: i32) -> (i32, i32) {
    %c0_i32 = arith.constant 0 : i32
    %c0_i32_0 = arith.constant 0 : i32
    return %c0_i32, %arg0 : i32, i32
  }
}

</mosaic_0001>

<bundles_post_ra>
// kernel: net_nomatrix16_forward.1
= control target key start
LH: loop header
LB: loop body
LE: loop exit
PB: predicated region body
PF: predicated region fallthrough
CT: control target
= control target key end

     0   :  { %v443_v2 = vmov 0   ;;  %vm65_vm0 = vcmask 130048   ;;  %s556_s0 = inlined_call_operand.vmem [shape: bf16[16,256], index: 0, kind: input, shape index: {}]   ;;  %s557_s1 = inlined_call_operand.vmem [shape: bf16[16,16], index: 1, kind: input, shape index: {}]   ;;  %s558_s2 = inlined_call_operand.vmem [shape: f32[16,1], index: 2, kind: input, shape index: {}]   ;;  %s559_s3 = inlined_call_operand.vmem [shape: bf16[16,16], index: 3, kind: input, shape index: {}]   ;;  %s560_s4 = inlined_call_operand.vmem [shape: f32[16,1], index: 4, kind: input, shape index: {}]   ;;  %s561_s5 = inlined_call_operand.vmem [shape: bf16[16,16], index: 5, kind: input, shape index: {}]   ;;  %s562_s6 = inlined_call_operand.vmem [shape: f32[16,1], index: 6, kind: input, shape index: {}]   ;;  %s563_s7 = inlined_call_operand.vmem [shape: bf16[8,16], index: 7, kind: input, shape index: {}]   ;;  %s564_s8 = inlined_call_operand.vmem [shape: f32[8,1], index: 8, kind: input, shape index: {}]   ;;  %s565_s9 = inlined_call_operand.hbm [shape: bf16[8,256], index: 9, kind: output, shape index: {}]  }
   0x1   :  { %v381_v0 = vld [vmem:[%s556_s0 + $0x4] ss:$8 sps:$4 sm:$0xff]   ;;  %v383_v1 = vld [vmem:[%s556_s0] ss:$8 sps:$4 sm:$0xff]   ;;  %101 = vmatprep.mubr.bf16.mxu0 %v443_v2  ;;  %379 = vset.pattern.permute.xlu0 %v443_v2 }
   0x2   :  { %69 = vmatprep.subr.bf16.mxu0 %v381_v0  ;;  %v384_v3 = vld [vmem:[%s557_s1] sm:$0xff]   ;;  %188 = vmatprep.mubr.bf16.mxu1 %v443_v2  ;;  %v39_v5 = vld [vmem:[%s558_s2 + $0x8] sm:$0xff] }
   0x3   :  { %v38_v4 = vld [vmem:[%s558_s2] sm:$0xff]  ;;  %70 = vmatpush1.bf16.msra.mxu0 %v383_v1  ;;  %380 = vset.pattern.permute.xlu1 %v443_v2 }
   0x4   :  { %42 = vperm.xlu0 %379, %v38_v4  }
   0x5   :  { %14 = vsyncpa [#allocation3], 0  ;;  %v207_v6 = vld [vmem:[%s562_s6] sm:$0xff]  ;;  %v137_v9 = vld [vmem:[%s560_s4 + $0x8] sm:$0xff]  ;;  %s444_s27 = smov [#allocation2]  }
   0x6   :  { %369 = vmatmul.mubr.msk.bf16.vlgmr.msra.gmra.mrb[0].mxu0 %vm65_vm0, %v384_v3  ;;  %v293_v7 = vld [vmem:[%s564_s8] sm:$0xff]  ;;  %v208_v10 = vld [vmem:[%s562_s6 + $0x8] sm:$0xff]  ;;  %s358_s28 = sshll.u32 %s444_s27, 4  ;;  %s359_s28 = int_to_ptr.vmem [resolvable:$true] %s358_s28 }
   0x7   :  { %259 = vmatprep.mubr.bf16.mxu0 %v443_v2  ;;  %v136_v8 = vld [vmem:[%s560_s4] sm:$0xff]  ;;  %s419_s29 = scalar_lea.vmem %s359_s28, 128  ;;  %p424_p1 = scmp.lt.s32.totalorder %s359_s28, %s359_s28 }
   0x8   :  { %47 = vperm.xlu0 %379, %v39_v5   ;;  %140 = vperm.xlu1 %380, %v136_v8   ;;  %v385_v43 = vld [vmem:[%s559_s3] sm:$0xff]   ;;  %p420_p0 = scmp.ne.s32.totalorder %s359_s28, %s419_s29  ;;  %p425_p2 = scmp.lt.s32.totalorder %s419_s29, %s419_s29 }
   0x9   :  { %v386_v60 = vld [vmem:[%s561_s5] sm:$0xff]  }
   0xa   :  { %p426_p3 = por %p425_p2, %p424_p1 }
   0xc   :  { %211 = vperm.xlu0 %379, %v207_v6   ;;  %145 = vperm.xlu1 %380, %v137_v9   ;;  %p427_p4 = pnand %p426_p3, %p420_p0 }
  0x10   :  { %296 = vperm.xlu0 %379, %v293_v7   ;;  %216 = vperm.xlu1 %380, %v208_v10  }
  0x83   :  { %v43_v11 = vpop.permute.xlu0 %42 }
  0x87   :  { %v48_v15 = vpop.permute.xlu0 %47  ;;  %v141_v44 = vpop.permute.xlu1 %140 }
  0x8b   :  { %v146_v48 = vpop.permute.xlu1 %145  ;;  %v212_v61 = vpop.permute.xlu0 %211 }
  0x8f   :  { %v217_v1 = vpop.permute.xlu1 %216 }
  0xd9   :  { %v103_v12 = vpop.f32.mrb[0].mxu0 }
  0xda   :  { %v104_v13 = vadd.f32 %v103_v12, %v43_v11  ;;  %v105_v14 = vpop.f32.mrb[1].mxu0 }
  0xdb   :  { %v106_v16 = vadd.f32 %v105_v14, %v43_v11  ;;  %v107_v17 = vpop.f32.mrb[2].mxu0 }
  0xdc   :  { %v112_v18 = vsub.f32 0.0, %v104_v13  ;;  %v108_v19 = vadd.f32 %v107_v17, %v48_v15  ;;  %v109_v20 = vpop.f32.mrb[3].mxu0 }
  0xdd   :  { %v113_v21 = vsub.f32 0.0, %v106_v16  ;;  %v110_v22 = vadd.f32 %v109_v20, %v48_v15 }
  0xde   :  { %v116_v23 = vmul.f32 1.442695, %v112_v18  ;;  %v114_v24 = vsub.f32 0.0, %v108_v19 }
  0xdf   :  { %v118_v25 = vmul.f32 1.442695, %v113_v21  ;;  %v115_v26 = vsub.f32 0.0, %v110_v22 }
  0xe0   :  { %387 = vpow2.f32 %v116_v23  ;;  %v120_v27 = vmul.f32 1.442695, %v114_v24 }
  0xe1   :  { %389 = vpow2.f32 %v118_v25  ;;  %v122_v28 = vmul.f32 1.442695, %v115_v26 }
  0xe2   :  { %391 = vpow2.f32 %v120_v27 }
  0xe3   :  { %393 = vpow2.f32 %v122_v28 }
  0xea   :  { %v388_v29 = vpop.eup %387 }
  0xeb   :  { %v390_v30 = vpop.eup %389  ;;  %v124_v31 = vadd.f32 1.0, %v388_v29  ;;  %v290_v29 = vld [vmem:[%s563_s7] sm:$0xf] }
  0xec   :  { %v392_v32 = vpop.eup %391  ;;  %v125_v33 = vadd.f32 1.0, %v390_v30  ;;  %v297_v30 = vpop.permute.xlu0 %296 }
  0xed   :  { %v394_v34 = vpop.eup %393  ;;  %395 = vrcp.f32 %v124_v31  ;;  %v126_v35 = vadd.f32 1.0, %v392_v32 }
  0xee   :  { %397 = vrcp.f32 %v125_v33  ;;  %v127_v36 = vadd.f32 1.0, %v394_v34 }
  0xef   :  { %399 = vrcp.f32 %v126_v35 }
  0xf0   :  { %401 = vrcp.f32 %v127_v36 }
  0xf7   :  { %v396_v37 = vpop.eup %395 }
  0xf8   :  { %v398_v38 = vpop.eup %397 }
  0xf9   :  { %v400_v39 = vpop.eup %399 }
  0xfa   :  { %v402_v40 = vpop.eup %401  ;;  %v134_v41 = vpack.c.bf16 %v400_v39, %v396_v37 }
  0xfb   :  { %v135_v42 = vpack.c.bf16 %v402_v40, %v398_v38 }
  0xfd   :  { %156 = vmatprep.subr.bf16.mxu1 %v135_v42 }
  0xfe   :  { %157 = vmatpush1.bf16.msra.mxu1 %v134_v41 }
 0x101   :  { %371 = vmatmul.mubr.msk.bf16.vlgmr.msra.gmra.mrb[0].mxu1 %vm65_vm0, %v385_v43 }
 0x102   :  { %334 = vmatprep.mubr.bf16.mxu1 %v443_v2 }
 0x1d4   :  { %v190_v45 = vpop.f32.mrb[0].mxu1 }
 0x1d5   :  { %v191_v46 = vadd.f32 %v190_v45, %v141_v44  ;;  %v192_v47 = vpop.f32.mrb[1].mxu1 }
 0x1d6   :  { %v193_v49 = vadd.f32 %v192_v47, %v141_v44  ;;  %v194_v50 = vpop.f32.mrb[2].mxu1 }
 0x1d7   :  { %v195_v51 = vadd.f32 %v194_v50, %v146_v48  ;;  %v196_v52 = vpop.f32.mrb[3].mxu1  ;;  %v199_v54 = vmax.f32 %v191_v46, 0.0 }
 0x1d8   :  { %v197_v53 = vadd.f32 %v196_v52, %v146_v48  ;;  %v200_v56 = vmax.f32 %v193_v49, 0.0 }
 0x1d9   :  { %v201_v55 = vmax.f32 %v195_v51, 0.0 }
 0x1da   :  { %v202_v57 = vmax.f32 %v197_v53, 0.0 }
 0x1db   :  { %v205_v58 = vpack.c.bf16 %v201_v55, %v199_v54 }
 0x1dc   :  { %v206_v59 = vpack.c.bf16 %v202_v57, %v200_v56 }
 0x1de   :  { %227 = vmatprep.subr.bf16.mxu0 %v206_v59 }
 0x1df   :  { %228 = vmatpush1.bf16.msra.mxu0 %v205_v58 }
 0x1e2   :  { %373 = vmatmul.mubr.msk.bf16.vlgmr.msra.gmra.mrb[4].mxu0 %vm65_vm0, %v386_v60 }
 0x2b5   :  { %v261_v62 = vpop.f32.mrb[4].mxu0 }
 0x2b6   :  { %v262_v63 = vadd.f32 %v261_v62, %v212_v61  ;;  %v263_v0 = vpop.f32.mrb[5].mxu0 }
 0x2b7   :  { %v264_v2 = vadd.f32 %v263_v0, %v212_v61  ;;  %v265_v3 = vpop.f32.mrb[6].mxu0 }
 0x2b8   :  { %v270_v4 = vsub.f32 0.0, %v262_v63  ;;  %v266_v5 = vadd.f32 %v265_v3, %v217_v1  ;;  %v267_v6 = vpop.f32.mrb[7].mxu0 }
 0x2b9   :  { %v271_v7 = vsub.f32 0.0, %v264_v2  ;;  %v268_v8 = vadd.f32 %v267_v6, %v217_v1 }
 0x2ba   :  { %v274_v9 = vmul.f32 1.442695, %v270_v4  ;;  %v272_v10 = vsub.f32 0.0, %v266_v5 }
 0x2bb   :  { %v276_v11 = vmul.f32 1.442695, %v271_v7  ;;  %v273_v12 = vsub.f32 0.0, %v268_v8 }
 0x2bc   :  { %403 = vpow2.f32 %v274_v9  ;;  %v278_v13 = vmul.f32 1.442695, %v272_v10 }
 0x2bd   :  { %405 = vpow2.f32 %v276_v11  ;;  %v280_v14 = vmul.f32 1.442695, %v273_v12 }
 0x2be   :  { %407 = vpow2.f32 %v278_v13 }
 0x2bf   :  { %409 = vpow2.f32 %v280_v14 }
 0x2c6   :  { %v404_v15 = vpop.eup %403 }
 0x2c7   :  { %v406_v16 = vpop.eup %405  ;;  %v282_v17 = vadd.f32 1.0, %v404_v15 }
 0x2c8   :  { %v408_v18 = vpop.eup %407  ;;  %v283_v19 = vadd.f32 1.0, %v406_v16 }
 0x2c9   :  { %v410_v20 = vpop.eup %409  ;;  %411 = vrcp.f32 %v282_v17  ;;  %v284_v21 = vadd.f32 1.0, %v408_v18 }
 0x2ca   :  { %413 = vrcp.f32 %v283_v19  ;;  %v285_v22 = vadd.f32 1.0, %v410_v20 }
 0x2cb   :  { %415 = vrcp.f32 %v284_v21 }
 0x2cc   :  { %417 = vrcp.f32 %v285_v22 }
 0x2d3   :  { %v412_v23 = vpop.eup %411 }
 0x2d4   :  { %v414_v24 = vpop.eup %413 }
 0x2d5   :  { %v416_v25 = vpop.eup %415 }
 0x2d6   :  { %v418_v26 = vpop.eup %417  ;;  %v291_v27 = vpack.c.bf16 %v416_v25, %v412_v23 }
 0x2d7   :  { %v292_v28 = vpack.c.bf16 %v418_v26, %v414_v24 }
 0x2d9   :  { %302 = vmatprep.subr.bf16.mxu1 %v292_v28 }
 0x2da   :  { %303 = vmatpush1.bf16.msra.mxu1 %v291_v27 }
 0x2dd   :  { %374 = vmatmul.mubr.msk.bf16.vlgmr.msra.gmra.mrb[4].mxu1 %vm65_vm0, %v290_v29 }
 0x3b0   :  { %v336_v31 = vpop.f32.mrb[4].mxu1 }
 0x3b1   :  { %v337_v32 = vadd.f32 %v336_v31, %v297_v30  ;;  %v338_v33 = vpop.f32.mrb[5].mxu1 }
 0x3b2   :  { %v339_v34 = vadd.f32 %v338_v33, %v297_v30  ;;  %v340_v35 = vpop.f32.mrb[6].mxu1 }
 0x3b3   :  { %v341_v36 = vpop.f32.mrb[7].mxu1 }
 0x3b4   :  { %v376_v37 = vpack.c.bf16 %v339_v34, %v337_v32 }
 0x3b6   :  { %351 = vst [vmem:[#allocation2] sm:$0xff] %v376_v37 }
 0x3b7   :  { %430 = shalt.err (!%p427_p4)
}
 0x3b8   :  { %s431_s10 = scalar_lea.hbm %s565_s9, 128 }
 0x3b9   :  { %p432_p5 = scmp.ne.s32.totalorder %s565_s9, %s431_s10  ;;  %p435_p6 = scmp.lt.u32.totalorder %s431_s10, %s565_s9 }
 0x3bb   :  { %p437_p7 = pnand %p435_p6, %p432_p5 }
 0x3bd   :  { %440 = shalt.err (!%p437_p7)
}
 0x3be   :  { %361 = dma.vmem_to_hbm [thread:$0]  %s359_s28, 128, %s565_s9, [#allocation3]  }
 0x3bf   :  { %441 = dma.done.wait [#allocation3], 128  }
 0x3c0   :  { %442 = vsyncadd [#allocation3], 4294967168 }
 0x3c1   :  { %365 = vsyncpa [#allocation3], 1 }

</bundles_post_ra>
